<compile_context>
chip_gen: v7x
topology: tpu7x:2x2x1
jax: 0.10.0
libtpu: 0.0.40
codegen_flags: <defaults>
</compile_context>

<pallas_src>
import functools
import math

import jax
import jax.numpy as jnp
from jax.experimental import pallas as pl
from jax.experimental.pallas import tpu as pltpu


# ----------------------------- Pallas kernels -----------------------------

def _pe_add_kernel(x_ref, pe_ref, o_ref, *, batch, d_model):
    # x_ref/o_ref: (blk_s, B*D); pe_ref: (blk_s, D)
    pe = pe_ref[...].astype(jnp.float32)
    for b in range(batch):                      # static unroll over batch lanes
        sl = slice(b * d_model, (b + 1) * d_model)
        y = x_ref[:, sl].astype(jnp.float32) + pe
        o_ref[:, sl] = y.astype(o_ref.dtype)


def _pe_add_dropout_kernel(x_ref, pe_ref, bits_ref, o_ref, *,
                           batch, d_model, threshold, scale):
    # x_ref/bits_ref/o_ref: (blk_s, B*D); pe_ref: (blk_s, D)
    pe = pe_ref[...].astype(jnp.float32)
    for b in range(batch):
        sl = slice(b * d_model, (b + 1) * d_model)
        y = x_ref[:, sl].astype(jnp.float32) + pe
        keep = bits_ref[:, sl] >= jnp.int32(threshold)
        y = jnp.where(keep, y * jnp.float32(scale), jnp.zeros_like(y))
        o_ref[:, sl] = y.astype(o_ref.dtype)


# ------------------------------ JAX wrapper -------------------------------

def make_positional_encoding_buffer(d_model, max_len=5000, dtype=jnp.float32):
    """Deterministic `pe` buffer, numerically identical to the PyTorch
    __init__.  Returned as (max_len, d_model) — torch's (max_len, 1, d_model)
    with the singleton batch dim squeezed (the kernel broadcasts over batch)."""
    position = jnp.arange(max_len, dtype=jnp.float32)[:, None]
    div_term = jnp.exp(jnp.arange(0, d_model, 2, dtype=jnp.float32)
                       * (-math.log(10000.0) / d_model))
    pe = jnp.zeros((max_len, d_model), dtype=jnp.float32)
    pe = pe.at[:, 0::2].set(jnp.sin(position * div_term))
    pe = pe.at[:, 1::2].set(jnp.cos(position * div_term))
    return pe.astype(dtype)


def _dropout_threshold(p):
    # int32 random bits are uniform over [-2^31, 2^31); drop the lowest p
    # fraction of that range -> keep iff bits >= threshold.
    t = int(round(float(p) * (2 ** 32))) - (2 ** 31)
    return max(-(2 ** 31), min(t, 2 ** 31 - 1))


def _dropout_bits(key, shape):
    bits = jax.random.bits(key, shape, dtype=jnp.uint32)
    return jax.lax.bitcast_convert_type(bits, jnp.int32)


def _pick_blk_s(S, bytes_per_row, vmem_budget_bytes=12 * 1024 * 1024,
                max_rows=1024):
    """Largest row-tile whose double-buffered blocks fit the VMEM budget."""
    rows = vmem_budget_bytes // max(1, 2 * bytes_per_row)
    rows = min(rows, max_rows)
    if S <= max(rows, 8):
        return S                             # one full block (full-dim escape)
    return max(8, (rows // 8) * 8)           # multiple of 8 for (8,128) tiling


def positional_encoding_forward(x, pe, *, p=0.1, training=False, key=None):
    """dropout(x + pe[:S]).  x: (S, B, D), pe: (max_len, D)."""
    S, B, D = x.shape
    BD = B * D
    x2d = x.reshape(S, BD)                                   # free reshape
    itemsize = jnp.dtype(x.dtype).itemsize
    apply_dropout = bool(training) and float(p) > 0.0

    bytes_per_row = 2 * BD * itemsize + D * 4                # x + out + pe
    if apply_dropout:
        bytes_per_row += BD * 4                              # random bits
    blk_s = _pick_blk_s(S, bytes_per_row)

    grid = (pl.cdiv(S, blk_s),)
    x_spec = pl.BlockSpec((blk_s, BD), lambda i: (i, 0))
    pe_spec = pl.BlockSpec((blk_s, D), lambda i: (i, 0))
    bits_spec = pl.BlockSpec((blk_s, BD), lambda i: (i, 0))
    out_spec = pl.BlockSpec((blk_s, BD), lambda i: (i, 0))
    out_shape = jax.ShapeDtypeStruct((S, BD), x.dtype)

    # If blk_s is not a multiple of 8 it must equal the full row extent of
    # every blocked operand, so slice pe to exactly S rows only in that case;
    # otherwise pass the full pe buffer and let the index_map pick rows.
    pe_in = pe if blk_s % 8 == 0 else pe[:S]

    cparams = pltpu.CompilerParams(
        dimension_semantics=("parallel",),
        vmem_limit_bytes=32 * 1024 * 1024,
    )

    if not apply_dropout:
        kernel = functools.partial(_pe_add_kernel, batch=B, d_model=D)
        out2d = pl.pallas_call(
            kernel,
            grid=grid,
            in_specs=[x_spec, pe_spec],
            out_specs=out_spec,
            out_shape=out_shape,
            compiler_params=cparams,
        )(x2d, pe_in)
    else:
        if key is None:
            raise ValueError("training-mode dropout requires a PRNG `key`")
        bits = _dropout_bits(key, (S, BD))
        kernel = functools.partial(
            _pe_add_dropout_kernel, batch=B, d_model=D,
            threshold=_dropout_threshold(p),
            scale=1.0 / (1.0 - float(p)),
        )
        out2d = pl.pallas_call(
            kernel,
            grid=grid,
            in_specs=[x_spec, pe_spec, bits_spec],
            out_specs=out_spec,
            out_shape=out_shape,
            compiler_params=cparams,
        )(x2d, pe_in, bits)

    return out2d.reshape(S, B, D)


# --------------------------------- main ------------------------------------

if __name__ == "__main__":
    key = jax.random.PRNGKey(0)
    S, B, D = 8, 2, 32                                   # seq=8, batch=2, d_model=32
    x = jax.random.normal(key, (S, B, D), dtype=jnp.float32)
    pe = make_positional_encoding_buffer(D, max_len=64)  # (64, 32)
    pe_s = pe[:S]                                        # (S, D) reference slice

    # Eval-mode forward (dropout = identity): exact check.
    out_eval = positional_encoding_forward(x, pe, p=0.1, training=False)
    jax.block_until_ready(out_eval)
    ref_eval = x + pe_s[:, None, :]
    assert out_eval.shape == (S, B, D)
    assert jnp.allclose(out_eval, ref_eval, atol=1e-6), "eval-mode mismatch"

    # Training-mode forward (inverted dropout with externally supplied bits):
    # reproduce the mask host-side for an exact reference check.
    p = 0.1
    drop_key = jax.random.PRNGKey(42)
    out_train = positional_encoding_forward(x, pe, p=p, training=True, key=drop_key)
    jax.block_until_ready(out_train)
    bits_ref = _dropout_bits(drop_key, (S, B * D)).reshape(S, B, D)
    keep_ref = bits_ref >= _dropout_threshold(p)
    ref_train = jnp.where(keep_ref, (x + pe_s[:, None, :]) * (1.0 / (1.0 - p)), 0.0)
    assert out_train.shape == (S, B, D)
    assert jnp.allclose(out_train, ref_train, atol=1e-5), "train-mode mismatch"

    print("KERNEL_OK")
</pallas_src>

<mosaic_0001>
module attributes {stable_mosaic.version = 11 : i64} {
  func.func @_pe_add_kernel(%arg0: i32, %arg1: memref<8x64xf32, #tpu.memory_space<vmem>>, %arg2: memref<8x32xf32, #tpu.memory_space<vmem>>, %arg3: memref<8x64xf32, #tpu.memory_space<vmem>>) attributes {dimension_semantics = [#tpu.dimension_semantics<parallel>], iteration_bounds = array<i64: 1>, scalar_prefetch = 0 : i64, scratch_operands = 0 : i64, tpu.core_type = #tpu.core_type<tc>, window_params = [{transform_indices = @transform_0, window_bounds = array<i64: 8, 64>}, {transform_indices = @transform_1, window_bounds = array<i64: 8, 32>}, {transform_indices = @transform_2, window_bounds = array<i64: 8, 64>}]} {
    %c0 = arith.constant 0 : index
    %c0_0 = arith.constant 0 : index
    %0 = vector.load %arg2[%c0, %c0_0] : memref<8x32xf32, #tpu.memory_space<vmem>>, vector<8x32xf32>
    %c0_1 = arith.constant 0 : index
    %c0_2 = arith.constant 0 : index
    %1 = vector.load %arg1[%c0_1, %c0_2] : memref<8x64xf32, #tpu.memory_space<vmem>>, vector<8x32xf32>
    %2 = arith.addf %1, %0 : vector<8x32xf32>
    %c0_3 = arith.constant 0 : index
    %c0_4 = arith.constant 0 : index
    %3 = vector.load %arg3[%c0_3, %c0_4] : memref<8x64xf32, #tpu.memory_space<vmem>>, vector<8x32xf32>
    tpu.vector_store %arg3[%c0_3, %c0_4], %2 {strides = array<i32>} : memref<8x64xf32, #tpu.memory_space<vmem>>, vector<8x32xf32>,
    %c0_5 = arith.constant 0 : index
    %c32 = arith.constant 32 : index
    %4 = vector.load %arg1[%c0_5, %c32] : memref<8x64xf32, #tpu.memory_space<vmem>>, vector<8x32xf32>
    %5 = arith.addf %4, %0 : vector<8x32xf32>
    %c0_6 = arith.constant 0 : index
    %c32_7 = arith.constant 32 : index
    %6 = vector.load %arg3[%c0_6, %c32_7] : memref<8x64xf32, #tpu.memory_space<vmem>>, vector<8x32xf32>
    tpu.vector_store %arg3[%c0_6, %c32_7], %5 {strides = array<i32>} : memref<8x64xf32, #tpu.memory_space<vmem>>, vector<8x32xf32>,
    return
  }
  func.func @transform_0(%arg0: i32) -> (i32, i32) {
    %c0_i32 = arith.constant 0 : i32
    %c0_i32_0 = arith.constant 0 : i32
    return %arg0, %c0_i32 : i32, i32
  }
  func.func @transform_1(%arg0: i32) -> (i32, i32) {
    %c0_i32 = arith.constant 0 : i32
    %c0_i32_0 = arith.constant 0 : i32
    return %arg0, %c0_i32 : i32, i32
  }
  func.func @transform_2(%arg0: i32) -> (i32, i32) {
    %c0_i32 = arith.constant 0 : i32
    %c0_i32_0 = arith.constant 0 : i32
    return %arg0, %c0_i32 : i32, i32
  }
}

</mosaic_0001>

<bundles_post_ra>
// kernel: tpu_custom_call.1
= control target key start
LH: loop header
LB: loop body
LE: loop exit
PB: predicated region body
PF: predicated region fallthrough
CT: control target
= control target key end

     0   :  { %vm15_vm0 = vcmask 261120   ;;  %s100_s0 = inlined_call_operand.vmem [shape: f32[8,64], index: 0, kind: input, shape index: {}]   ;;  %s101_s1 = inlined_call_operand.vmem [shape: f32[64,32], index: 1, kind: input, shape index: {}]   ;;  %s102_s2 = inlined_call_operand.hbm [shape: f32[8,64], index: 2, kind: output, shape index: {}]  }
   0x1   :  { %v12_v0 = vld [vmem:[%s101_s1] sm:$0xff] }
   0x2   :  { %v13_v1 = vld [vmem:[%s100_s0] sm:$0xff] }
   0x3   :  { %7 = vsyncpa [#allocation3], 0  ;;  %v14_v2 = vadd.f32 %v13_v1, %v12_v0  ;;  %s65_s13 = smov 32   ;;  %s66_s14 = smov [#allocation2]   ;;  %vm23_vm1 = vcmask 523520  }
   0x4   :  { %19 = vrot.lane.b32.xlu0 %v12_v0, %s65_s13  ;;  %s31_s15 = sshll.u32 %s66_s14, 4  ;;  %s32_s15 = int_to_ptr.vmem [resolvable:$true] %s31_s15 }
   0x5   :  { %16 = vst.msk [vmem:[#allocation2] sm:$0xff] %vm15_vm0, %v14_v2  ;;  %s41_s16 = scalar_lea.vmem %s32_s15, 128  ;;  %p46_p1 = scmp.lt.s32.totalorder %s32_s15, %s32_s15 }
   0x6   :  { %p42_p0 = scmp.ne.s32.totalorder %s32_s15, %s41_s16  ;;  %p47_p2 = scmp.lt.s32.totalorder %s41_s16, %s41_s16 }
   0x8   :  { %p48_p3 = por %p47_p2, %p46_p1 }
   0xa   :  { %p49_p4 = pnand %p48_p3, %p42_p0 }
  0x76   :  { %v20_v3 = vpop.permute.xlu0 %19 }
  0x77   :  { %v22_v4 = vadd.f32 %v20_v3, %v13_v1 }
  0x79   :  { %24 = vst.msk [vmem:[#allocation2] sm:$0xff] %vm23_vm1, %v22_v4 }
  0x7a   :  { %52 = shalt.err (!%p49_p4)
}
  0x7b   :  { %s53_s17 = scalar_lea.hbm %s102_s2, 128 }
  0x7c   :  { %p54_p5 = scmp.ne.s32.totalorder %s102_s2, %s53_s17  ;;  %p57_p6 = scmp.lt.u32.totalorder %s53_s17, %s102_s2 }
  0x7e   :  { %p59_p7 = pnand %p57_p6, %p54_p5 }
  0x80   :  { %62 = shalt.err (!%p59_p7)
}
  0x81   :  { %34 = dma.vmem_to_hbm [thread:$0]  %s32_s15, 128, %s102_s2, [#allocation3]  }
  0x82   :  { %63 = dma.done.wait [#allocation3], 128  }
  0x83   :  { %64 = vsyncadd [#allocation3], 4294967168 }
  0x84   :  { %38 = vsyncpa [#allocation3], 1 }

</bundles_post_ra>
